<compile_context>
chip_gen: v5e
topology: v5e:2x2
jax: 0.10.0
libtpu: 0.0.40
codegen_flags: <defaults>
</compile_context>

<pallas_src>
import jax
import jax.numpy as jnp
from jax.experimental import pallas as pl
from jax.experimental.pallas import tpu as pltpu

EPS = 1e-5  # nn.LayerNorm default


def layer_norm(x, g, b, eps=EPS):
    mu = jnp.mean(x, axis=-1, keepdims=True)
    var = jnp.mean((x - mu) ** 2, axis=-1, keepdims=True)
    return (x - mu) * jax.lax.rsqrt(var + eps) * g + b


def _round_up(x, m):
    return ((x + m - 1) // m) * m


def _vmem_capacity_bytes():
    try:
        return int(pltpu.get_tpu_info().vmem_capacity_bytes)
    except Exception:
        return 64 * 1024 * 1024          # conservative: v7x per-TC VMEM


def _vmem_limit_bytes():
    cap = _vmem_capacity_bytes()
    # ~48 MiB on v7x (64 MiB/TC), ~96 MiB on v5e/v6e (128 MiB); leaves headroom
    # for compiler-internal scratch.
    return int(min(cap * 3 // 4, cap - (16 << 20)))


def _pick_cell_tile(NC, H, Fc, Ffs, Vs, twoE, B):
    cap = _vmem_capacity_bytes()
    budget = int(cap * 0.45)
    # resident (per-batch, double-buffered) blocks: table, vals(bf16), flat_cell, weights
    resident = 2 * (4 * Vs * H + 2 * twoE * H + 4 * twoE + 4 * Ffs * H + 4 * 7 * H)
    # per-cell bytes: double-buffered streaming blocks + in-kernel intermediates
    per_cell = (2 * (4 * Fc + 4 * Ffs + 4 + 4 * H)   # idx, float, ve-mask, out streams
                + 2 * twoE                           # bf16 scatter one-hot
                + 4 * Vs                             # f32 cate multi-hot
                + 4 * 4 * H)                         # cemb/femb/val/delta temps
    ct = max(8, (budget - resident) // max(per_cell, 1))
    ct = min(ct, max(8, (NC // 8) * 8))
    if B == 1:  # keep >= 2 grid steps so both v7x TensorCores get work
        ct = min(ct, max(8, _round_up(pl.cdiv(NC, 2), 8)))
    return int(max(8, (ct // 8) * 8))


def _pick_bond_tile(M8, H, Ffb):
    cap = _vmem_capacity_bytes()
    budget = int(cap * 0.45)
    per_row = 2 * 4 * (H + Ffb + 1 + 2 * H) + 4 * 4 * H
    tb = max(8, budget // max(per_row, 1))
    return int(min(M8, max(8, (tb // 8) * 8)))


def _const_spec(shape):
    zeros = (0,) * len(shape)
    return pl.BlockSpec(shape, lambda *_: zeros)


# ---------------------------------------------------------------------------
# Pallas kernel 1: bond embedding (LN + Linear + LN + mask) + reverse projection
# Rows = flattened (B*E); single row-tiled grid (weights are batch-invariant).
# ---------------------------------------------------------------------------
def bond_embedding_kernel(cate_ref, flt_ref, mask_ref,
                          wf_ref, bf_ref, lncg_ref, lncb_ref,
                          lnfg_ref, lnfb_ref, wrev_ref, brev_ref,
                          hb_ref, hbrev_ref):
    cemb = layer_norm(cate_ref[...], lncg_ref[...], lncb_ref[...])         # (TB, H)
    femb = jnp.dot(flt_ref[...], wf_ref[...],
                   preferred_element_type=jnp.float32) + bf_ref[...]       # (TB, H)
    femb = layer_norm(femb, lnfg_ref[...], lnfb_ref[...])
    hb = (cemb + femb) * mask_ref[...]
    hb_ref[...] = hb
    hbrev_ref[...] = jnp.dot(hb, wrev_ref[...],
                             preferred_element_type=jnp.float32) + brev_ref[...]


# ---------------------------------------------------------------------------
# Pallas kernel 2: structure matrix over flattened cells.
#   - categorical gather fused as multi-hot @ table (MXU)
#   - float Linear as one (CT, Ff) @ (Ff, H) matmul (MXU)
#   - virtual-edge overwrite via a precomputed (cells, 1) mask
#   - bond scatter-add as bf16 one-hot (CT, 2E) @ (2E, H) matmul (MXU)
# ---------------------------------------------------------------------------
def structure_matrix_kernel(idx_ref, flt_ref, vem_ref, cell_ref, vals_ref,
                            tab_ref, ve_ref, wf_ref, bf_ref,
                            lncg_ref, lncb_ref, lnfg_ref, lnfb_ref, o_ref):
    CT, Fc = idx_ref.shape[1], idx_ref.shape[2]
    Vs = tab_ref.shape[0]
    twoE = cell_ref.shape[2]
    cell_start = pl.program_id(1) * CT

    # categorical branch: gather-as-multi-hot MXU matmul (indices carry the
    # per-feature table offsets already).
    gidx = idx_ref[0]                                                      # (CT, Fc)
    vocab_iota = jax.lax.broadcasted_iota(jnp.int32, (CT, Vs), 1)
    mh = jnp.zeros((CT, Vs), jnp.float32)
    for f in range(Fc):                                                    # Fc small & static
        mh = mh + (vocab_iota == gidx[:, f:f + 1]).astype(jnp.float32)
    cemb = jnp.dot(mh, tab_ref[...], preferred_element_type=jnp.float32)   # (CT, H)
    cemb = layer_norm(cemb, lncg_ref[...], lncb_ref[...])

    # float branch: one MXU matmul + LayerNorm
    femb = jnp.dot(flt_ref[0], wf_ref[...],
                   preferred_element_type=jnp.float32) + bf_ref[...]       # (CT, H)
    femb = layer_norm(femb, lnfg_ref[...], lnfb_ref[...])

    val = cemb + femb                                                      # (CT, H)

    # virtual-edge overwrite on global row 0 / col 0
    val = jnp.where(vem_ref[...] > 0, ve_ref[...], val)

    # bond scatter-add as a bf16 one-hot matmul (handles duplicate targets by
    # accumulation, no dynamic sublane writes).
    idx = cell_ref[0]                                                      # (1, 2E)
    local = idx - cell_start
    valid = jnp.logical_and(local >= 0, local < CT)
    tgt = jnp.where(valid, local, -1)
    cell_iota = jax.lax.broadcasted_iota(jnp.int32, (CT, twoE), 0)
    onehot = (cell_iota == tgt).astype(jnp.bfloat16)                       # exact 0/1
    delta = jnp.dot(onehot, vals_ref[0],
                    preferred_element_type=jnp.float32)                    # (CT, H)

    o_ref[0] = (val + delta).astype(o_ref.dtype)


# ---------------------------------------------------------------------------
# Plain-JAX glue: bond embedding-table gather + sum (small, irregular gather)
# ---------------------------------------------------------------------------
def cate_embed_sum(p, x):
    return jnp.take(p['table'], x + p['starts'], axis=0).sum(axis=-2)


# ---------------------------------------------------------------------------
# Wrapper: StructureEmbeddingLayer.forward
# ---------------------------------------------------------------------------
def structure_embedding_layer_pallas(p, bond_index, bond_feat_cate, bond_feat_float,
                                     bond_mask, structure_feat_cate,
                                     structure_feat_float, *, cell_tile=None,
                                     bond_tile=None, out_dtype=jnp.float32,
                                     vmem_limit_bytes=None):
    H = p['virtual_edge'].shape[-1]
    B, A = structure_feat_cate.shape[0], structure_feat_cate.shape[1]
    N = A + 1
    NC = N * N
    E = bond_index.shape[-1]
    twoE = 2 * E
    Fc = structure_feat_cate.shape[-1]
    Ffb = bond_feat_float.shape[-1]
    Ffs = structure_feat_float.shape[-1]
    Vs = p['struct_cate']['table'].shape[0]

    if vmem_limit_bytes is None:
        vmem_limit_bytes = _vmem_limit_bytes()

    bc, bf = p['bond_cate'], p['bond_float']
    sc, sf = p['struct_cate'], p['struct_float']

    # ---- kernel 1: bond embeddings + reversed-bond projection --------------
    M = B * E
    M8 = _round_up(M, 8)
    bond_cate_sum = cate_embed_sum(bc, bond_feat_cate).reshape(M, H)
    bond_cate_sum = jnp.pad(bond_cate_sum, ((0, M8 - M), (0, 0)))
    bflt = jnp.pad(bond_feat_float.reshape(M, Ffb), ((0, M8 - M), (0, 0)))
    bmask = jnp.pad(bond_mask.reshape(M, 1).astype(jnp.float32),
                    ((0, M8 - M), (0, 0)))
    TB = int(bond_tile) if bond_tile is not None else _pick_bond_tile(M8, H, Ffb)

    hb, hb_rev = pl.pallas_call(
        bond_embedding_kernel,
        out_shape=(jax.ShapeDtypeStruct((M8, H), jnp.float32),
                   jax.ShapeDtypeStruct((M8, H), jnp.float32)),
        grid=(pl.cdiv(M8, TB),),
        in_specs=[
            pl.BlockSpec((TB, H), lambda i: (i, 0)),
            pl.BlockSpec((TB, Ffb), lambda i: (i, 0)),
            pl.BlockSpec((TB, 1), lambda i: (i, 0)),
            _const_spec((Ffb, H)), _const_spec((1, H)),
            _const_spec((1, H)), _const_spec((1, H)),
            _const_spec((1, H)), _const_spec((1, H)),
            _const_spec((H, H)), _const_spec((1, H)),
        ],
        out_specs=(pl.BlockSpec((TB, H), lambda i: (i, 0)),
                   pl.BlockSpec((TB, H), lambda i: (i, 0))),
        compiler_params=pltpu.CompilerParams(
            dimension_semantics=("parallel",),
            vmem_limit_bytes=vmem_limit_bytes),
    )(bond_cate_sum, bflt, bmask,
      bf['w'], bf['b'], bc['ln_g'], bc['ln_b'], bf['ln_g'], bf['ln_b'],
      p['bond_rev_w'], p['bond_rev_b'])
    hb = hb[:M].reshape(B, E, H)
    hb_rev = hb_rev[:M].reshape(B, E, H)

    # ---- kernel 2 inputs: tiny index / feature / mask streams --------------
    # structure cate: ship only int32 indices (table offsets folded in),
    # padded with a leading virtual row/col (overwritten by the ve mask).
    sc_idx = structure_feat_cate.astype(jnp.int32) + sc['starts']
    sc_idx = jnp.pad(sc_idx, ((0, 0), (1, 0), (1, 0), (0, 0))).reshape(B, NC, Fc)
    sf_flt = jnp.pad(structure_feat_float,
                     ((0, 0), (1, 0), (1, 0), (0, 0))).reshape(B, NC, Ffs)

    rows = jnp.arange(N, dtype=jnp.int32)[:, None]
    cols = jnp.arange(N, dtype=jnp.int32)[None, :]
    ve_mask = jnp.logical_or(rows == 0, cols == 0).astype(jnp.float32).reshape(NC, 1)

    # scatter targets: flat cell (i+1)*N+(j+1) forward, swapped for reverse
    bi = (bond_index + 1).astype(jnp.int32)
    fwd = bi[:, 0, :] * N + bi[:, 1, :]
    rev = bi[:, 1, :] * N + bi[:, 0, :]
    flat_cell = jnp.concatenate((fwd, rev), axis=-1)[:, None, :]      # (B, 1, 2E)
    vals = jnp.concatenate((hb, hb_rev), axis=1).astype(jnp.bfloat16)  # (B, 2E, H)

    CT = int(cell_tile) if cell_tile is not None else _pick_cell_tile(
        NC, H, Fc, Ffs, Vs, twoE, B)
    C = pl.cdiv(NC, CT)

    out = pl.pallas_call(
        structure_matrix_kernel,
        out_shape=jax.ShapeDtypeStruct((B, NC, H), out_dtype),
        grid=(B, C),
        in_specs=[
            pl.BlockSpec((1, CT, Fc), lambda b, c: (b, c, 0)),
            pl.BlockSpec((1, CT, Ffs), lambda b, c: (b, c, 0)),
            pl.BlockSpec((CT, 1), lambda b, c: (c, 0)),
            pl.BlockSpec((1, 1, twoE), lambda b, c: (b, 0, 0)),
            pl.BlockSpec((1, twoE, H), lambda b, c: (b, 0, 0)),
            _const_spec((Vs, H)), _const_spec((1, H)),
            _const_spec((Ffs, H)), _const_spec((1, H)),
            _const_spec((1, H)), _const_spec((1, H)),
            _const_spec((1, H)), _const_spec((1, H)),
        ],
        out_specs=pl.BlockSpec((1, CT, H), lambda b, c: (b, c, 0)),
        compiler_params=pltpu.CompilerParams(
            dimension_semantics=("parallel", "parallel"),
            vmem_limit_bytes=vmem_limit_bytes),
    )(sc_idx, sf_flt, ve_mask, flat_cell, vals,
      sc['table'], p['virtual_edge'], sf['w'], sf['b'],
      sc['ln_g'], sc['ln_b'], sf['ln_g'], sf['ln_b'])

    return out.reshape(B, N, N, H)


# ---------------------------------------------------------------------------
# Pure-JAX reference (for correctness check)
# ---------------------------------------------------------------------------
def _reference(p, bond_index, bond_feat_cate, bond_feat_float, bond_mask,
               structure_feat_cate, structure_feat_float):
    H = p['virtual_edge'].shape[-1]
    B, A = structure_feat_cate.shape[:2]
    N = A + 1

    def cate(pp, x):
        return layer_norm(cate_embed_sum(pp, x), pp['ln_g'], pp['ln_b'])

    def flt(pp, x):
        return layer_norm(x @ pp['w'] + pp['b'], pp['ln_g'], pp['ln_b'])

    hb = (cate(p['bond_cate'], bond_feat_cate)
          + flt(p['bond_float'], bond_feat_float)) * bond_mask[..., None]
    hb_rev = hb @ p['bond_rev_w'] + p['bond_rev_b']

    hs = jnp.zeros((B, N, N, H), jnp.float32)
    ve = jnp.broadcast_to(p['virtual_edge'], (B, N, H))
    hs = hs.at[:, 0, :, :].set(ve)
    hs = hs.at[:, :, 0, :].set(ve)
    inner = (cate(p['struct_cate'], structure_feat_cate)
             + flt(p['struct_float'], structure_feat_float))
    hs = hs.at[:, 1:, 1:, :].set(inner)

    bi = bond_index + 1
    br = jnp.arange(B)[:, None]
    hs = hs.at[br, bi[:, 0, :], bi[:, 1, :], :].add(hb)
    hs = hs.at[br, bi[:, 1, :], bi[:, 0, :], :].add(hb_rev)
    return hs


# ---------------------------------------------------------------------------
# Parameter init (PyTorch-equivalent shapes; weights stored input-major)
# ---------------------------------------------------------------------------
def init_params(cfg, key):
    H = cfg['hidden_size']
    keys = iter(jax.random.split(key, 32))

    def nrm(shape, std=0.02):
        return jax.random.normal(next(keys), shape, jnp.float32) * std

    def cate_params(nums):
        starts, s = [], 0
        for n in nums:
            starts.append(s)
            s += int(n)
        return dict(table=nrm((s, H)),
                    starts=jnp.asarray(starts, jnp.int32),
                    ln_g=jnp.ones((1, H), jnp.float32),
                    ln_b=jnp.zeros((1, H), jnp.float32))

    def float_params(din):
        return dict(w=nrm((din, H)), b=jnp.zeros((1, H), jnp.float32),
                    ln_g=jnp.ones((1, H), jnp.float32),
                    ln_b=jnp.zeros((1, H), jnp.float32))

    return dict(
        bond_cate=cate_params(cfg['nums_bond_feat_cate']),
        bond_float=float_params(cfg['num_bond_feat_float']),
        virtual_edge=nrm((1, H), std=1.0),
        struct_cate=cate_params(cfg['nums_structure_feat_cate']),
        struct_float=float_params(cfg['num_structure_feat_float']),
        bond_rev_w=nrm((H, H)),
        bond_rev_b=jnp.zeros((1, H), jnp.float32),
    )


# ---------------------------------------------------------------------------
if __name__ == "__main__":
    cfg = dict(
        hidden_size=32, head_size=8,
        nums_bond_feat_cate=[4, 6], num_bond_feat_float=3,
        nums_structure_feat_cate=[8, 5], num_structure_feat_float=2,
        input_dropout_prob=0.0,
    )
    key = jax.random.PRNGKey(0)
    pkey, dkey = jax.random.split(key)
    params = init_params(cfg, pkey)

    B, A, E = 2, 8, 6          # batch, atoms (max_node = 9), bonds
    ks = jax.random.split(dkey, 4)

    def rand_cate(k, prefix, nums):
        kk = jax.random.split(k, len(nums))
        cols = [jax.random.randint(kk[i], prefix, 0, n) for i, n in enumerate(nums)]
        return jnp.stack(cols, axis=-1).astype(jnp.int32)

    chain = jnp.arange(E, dtype=jnp.int32)
    bond_index = jnp.broadcast_to(jnp.stack((chain, chain + 1))[None],
                                  (B, 2, E)).astype(jnp.int32)
    bond_feat_cate = rand_cate(ks[0], (B, E), cfg['nums_bond_feat_cate'])
    bond_feat_float = jax.random.normal(ks[1], (B, E, cfg['num_bond_feat_float']),
                                        jnp.float32)
    bond_mask = jnp.ones((B, E), jnp.float32).at[:, E - 1].set(0.0)
    structure_feat_cate = rand_cate(ks[2], (B, A, A), cfg['nums_structure_feat_cate'])
    structure_feat_float = jax.random.normal(
        ks[3], (B, A, A, cfg['num_structure_feat_float']), jnp.float32)

    # cell_tile=48 deliberately exercises multiple cell tiles including a partial
    # edge tile (N*N = 81); at production sizes leave cell_tile=None and it is
    # derived from the generation's VMEM capacity.
    out = structure_embedding_layer_pallas(
        params, bond_index, bond_feat_cate, bond_feat_float, bond_mask,
        structure_feat_cate, structure_feat_float, cell_tile=48)
    out = jax.block_until_ready(out)
    assert out.shape == (B, A + 1, A + 1, cfg['hidden_size'])
    assert out.dtype == jnp.float32

    ref = jax.block_until_ready(_reference(
        params, bond_index, bond_feat_cate, bond_feat_float, bond_mask,
        structure_feat_cate, structure_feat_float))
    # loose tolerance: default-precision MXU f32 matmuls + bf16 scatter values
    err = float(jnp.max(jnp.abs(out - ref)))
    assert bool(jnp.allclose(out, ref, atol=3e-2, rtol=2e-2)), err

    print("KERNEL_OK")
</pallas_src>

<mosaic_0001>
module attributes {stable_mosaic.version = 11 : i64} {
  func.func @bond_embedding_kernel(%arg0: i32, %arg1: memref<16x32xf32, #tpu.memory_space<vmem>>, %arg2: memref<16x3xf32, #tpu.memory_space<vmem>>, %arg3: memref<16x1xf32, #tpu.memory_space<vmem>>, %arg4: memref<3x32xf32, #tpu.memory_space<vmem>>, %arg5: memref<1x32xf32, #tpu.memory_space<vmem>>, %arg6: memref<1x32xf32, #tpu.memory_space<vmem>>, %arg7: memref<1x32xf32, #tpu.memory_space<vmem>>, %arg8: memref<1x32xf32, #tpu.memory_space<vmem>>, %arg9: memref<1x32xf32, #tpu.memory_space<vmem>>, %arg10: memref<32x32xf32, #tpu.memory_space<vmem>>, %arg11: memref<1x32xf32, #tpu.memory_space<vmem>>, %arg12: memref<16x32xf32, #tpu.memory_space<vmem>>, %arg13: memref<16x32xf32, #tpu.memory_space<vmem>>) attributes {dimension_semantics = [#tpu.dimension_semantics<parallel>], iteration_bounds = array<i64: 1>, scalar_prefetch = 0 : i64, scratch_operands = 0 : i64, tpu.core_type = #tpu.core_type<tc>, window_params = [{transform_indices = @transform_0, window_bounds = array<i64: 16, 32>}, {transform_indices = @transform_1, window_bounds = array<i64: 16, 3>}, {transform_indices = @transform_2, window_bounds = array<i64: 16, 1>}, {pipeline_mode = #tpu.pipeline_mode<synchronous>, transform_indices = @transform_3, window_bounds = array<i64: 3, 32>}, {pipeline_mode = #tpu.pipeline_mode<synchronous>, transform_indices = @transform_4, window_bounds = array<i64: 1, 32>}, {pipeline_mode = #tpu.pipeline_mode<synchronous>, transform_indices = @transform_5, window_bounds = array<i64: 1, 32>}, {pipeline_mode = #tpu.pipeline_mode<synchronous>, transform_indices = @transform_6, window_bounds = array<i64: 1, 32>}, {pipeline_mode = #tpu.pipeline_mode<synchronous>, transform_indices = @transform_7, window_bounds = array<i64: 1, 32>}, {pipeline_mode = #tpu.pipeline_mode<synchronous>, transform_indices = @transform_8, window_bounds = array<i64: 1, 32>}, {pipeline_mode = #tpu.pipeline_mode<synchronous>, transform_indices = @transform_9, window_bounds = array<i64: 32, 32>}, {pipeline_mode = #tpu.pipeline_mode<synchronous>, transform_indices = @transform_10, window_bounds = array<i64: 1, 32>}, {transform_indices = @transform_11, window_bounds = array<i64: 16, 32>}, {transform_indices = @transform_12, window_bounds = array<i64: 16, 32>}]} {
    %c0 = arith.constant 0 : index
    %c0_0 = arith.constant 0 : index
    %0 = vector.load %arg1[%c0, %c0_0] : memref<16x32xf32, #tpu.memory_space<vmem>>, vector<16x32xf32>
    %c0_1 = arith.constant 0 : index
    %c0_2 = arith.constant 0 : index
    %1 = vector.load %arg6[%c0_1, %c0_2] : memref<1x32xf32, #tpu.memory_space<vmem>>, vector<1x32xf32>
    %c0_3 = arith.constant 0 : index
    %c0_4 = arith.constant 0 : index
    %2 = vector.load %arg7[%c0_3, %c0_4] : memref<1x32xf32, #tpu.memory_space<vmem>>, vector<1x32xf32>
    %cst = arith.constant dense<0.000000e+00> : vector<16xf32>
    %3 = vector.multi_reduction <add>, %0, %cst [1] : vector<16x32xf32> to vector<16xf32>
    %4 = vector.shape_cast %3 : vector<16xf32> to vector<16x1xf32>
    %cst_5 = arith.constant 3.200000e+01 : f32
    %5 = vector.broadcast %cst_5 : f32 to vector<16x1xf32>
    %6 = arith.divf %4, %5 : vector<16x1xf32>
    %7 = vector.broadcast %6 : vector<16x1xf32> to vector<16x32xf32>
    %8 = arith.subf %0, %7 : vector<16x32xf32>
    %9 = arith.mulf %8, %8 : vector<16x32xf32>
    %cst_6 = arith.constant dense<0.000000e+00> : vector<16xf32>
    %10 = vector.multi_reduction <add>, %9, %cst_6 [1] : vector<16x32xf32> to vector<16xf32>
    %11 = vector.shape_cast %10 : vector<16xf32> to vector<16x1xf32>
    %cst_7 = arith.constant 3.200000e+01 : f32
    %12 = vector.broadcast %cst_7 : f32 to vector<16x1xf32>
    %13 = arith.divf %11, %12 : vector<16x1xf32>
    %14 = vector.broadcast %6 : vector<16x1xf32> to vector<16x32xf32>
    %15 = arith.subf %0, %14 : vector<16x32xf32>
    %cst_8 = arith.constant 9.99999974E-6 : f32
    %16 = vector.broadcast %cst_8 : f32 to vector<16x1xf32>
    %17 = arith.addf %13, %16 : vector<16x1xf32>
    %18 = math.rsqrt %17 : vector<16x1xf32>
    %19 = vector.broadcast %18 : vector<16x1xf32> to vector<16x32xf32>
    %20 = arith.mulf %15, %19 : vector<16x32xf32>
    %21 = vector.broadcast %1 : vector<1x32xf32> to vector<16x32xf32>
    %22 = arith.mulf %20, %21 : vector<16x32xf32>
    %23 = vector.broadcast %2 : vector<1x32xf32> to vector<16x32xf32>
    %24 = arith.addf %22, %23 : vector<16x32xf32>
    %c0_9 = arith.constant 0 : index
    %c0_10 = arith.constant 0 : index
    %25 = vector.load %arg2[%c0_9, %c0_10] : memref<16x3xf32, #tpu.memory_space<vmem>>, vector<16x3xf32>
    %c0_11 = arith.constant 0 : index
    %c0_12 = arith.constant 0 : index
    %26 = vector.load %arg4[%c0_11, %c0_12] : memref<3x32xf32, #tpu.memory_space<vmem>>, vector<3x32xf32>
    %cst_13 = arith.constant dense<0.000000e+00> : vector<16x32xf32>
    %27 = tpu.matmul %25, %26, %cst_13 {dimension_numbers = #tpu.dot_dimension_numbers<[1], [0], [0], [1], [0, 0, 1, 1], [], []>} : vector<16x3xf32>, vector<3x32xf32>, vector<16x32xf32> -> vector<16x32xf32>
    %c0_14 = arith.constant 0 : index
    %c0_15 = arith.constant 0 : index
    %28 = vector.load %arg5[%c0_14, %c0_15] : memref<1x32xf32, #tpu.memory_space<vmem>>, vector<1x32xf32>
    %29 = vector.broadcast %28 : vector<1x32xf32> to vector<16x32xf32>
    %30 = arith.addf %27, %29 : vector<16x32xf32>
    %c0_16 = arith.constant 0 : index
    %c0_17 = arith.constant 0 : index
    %31 = vector.load %arg8[%c0_16, %c0_17] : memref<1x32xf32, #tpu.memory_space<vmem>>, vector<1x32xf32>
    %c0_18 = arith.constant 0 : index
    %c0_19 = arith.constant 0 : index
    %32 = vector.load %arg9[%c0_18, %c0_19] : memref<1x32xf32, #tpu.memory_space<vmem>>, vector<1x32xf32>
    %cst_20 = arith.constant dense<0.000000e+00> : vector<16xf32>
    %33 = vector.multi_reduction <add>, %30, %cst_20 [1] : vector<16x32xf32> to vector<16xf32>
    %34 = vector.shape_cast %33 : vector<16xf32> to vector<16x1xf32>
    %cst_21 = arith.constant 3.200000e+01 : f32
    %35 = vector.broadcast %cst_21 : f32 to vector<16x1xf32>
    %36 = arith.divf %34, %35 : vector<16x1xf32>
    %37 = vector.broadcast %36 : vector<16x1xf32> to vector<16x32xf32>
    %38 = arith.subf %30, %37 : vector<16x32xf32>
    %39 = arith.mulf %38, %38 : vector<16x32xf32>
    %cst_22 = arith.constant dense<0.000000e+00> : vector<16xf32>
    %40 = vector.multi_reduction <add>, %39, %cst_22 [1] : vector<16x32xf32> to vector<16xf32>
    %41 = vector.shape_cast %40 : vector<16xf32> to vector<16x1xf32>
    %cst_23 = arith.constant 3.200000e+01 : f32
    %42 = vector.broadcast %cst_23 : f32 to vector<16x1xf32>
    %43 = arith.divf %41, %42 : vector<16x1xf32>
    %44 = vector.broadcast %36 : vector<16x1xf32> to vector<16x32xf32>
    %45 = arith.subf %30, %44 : vector<16x32xf32>
    %cst_24 = arith.constant 9.99999974E-6 : f32
    %46 = vector.broadcast %cst_24 : f32 to vector<16x1xf32>
    %47 = arith.addf %43, %46 : vector<16x1xf32>
    %48 = math.rsqrt %47 : vector<16x1xf32>
    %49 = vector.broadcast %48 : vector<16x1xf32> to vector<16x32xf32>
    %50 = arith.mulf %45, %49 : vector<16x32xf32>
    %51 = vector.broadcast %31 : vector<1x32xf32> to vector<16x32xf32>
    %52 = arith.mulf %50, %51 : vector<16x32xf32>
    %53 = vector.broadcast %32 : vector<1x32xf32> to vector<16x32xf32>
    %54 = arith.addf %52, %53 : vector<16x32xf32>
    %55 = arith.addf %24, %54 : vector<16x32xf32>
    %c0_25 = arith.constant 0 : index
    %c0_26 = arith.constant 0 : index
    %56 = vector.load %arg3[%c0_25, %c0_26] : memref<16x1xf32, #tpu.memory_space<vmem>>, vector<16x1xf32>
    %57 = vector.broadcast %56 : vector<16x1xf32> to vector<16x32xf32>
    %58 = arith.mulf %55, %57 : vector<16x32xf32>
    %c0_27 = arith.constant 0 : index
    %c0_28 = arith.constant 0 : index
    %59 = vector.load %arg12[%c0_27, %c0_28] : memref<16x32xf32, #tpu.memory_space<vmem>>, vector<16x32xf32>
    tpu.vector_store %arg12[%c0_27, %c0_28], %58 {strides = array<i32>} : memref<16x32xf32, #tpu.memory_space<vmem>>, vector<16x32xf32>,
    %c0_29 = arith.constant 0 : index
    %c0_30 = arith.constant 0 : index
    %60 = vector.load %arg10[%c0_29, %c0_30] : memref<32x32xf32, #tpu.memory_space<vmem>>, vector<32x32xf32>
    %cst_31 = arith.constant dense<0.000000e+00> : vector<16x32xf32>
    %61 = tpu.matmul %58, %60, %cst_31 {dimension_numbers = #tpu.dot_dimension_numbers<[1], [0], [0], [1], [0, 0, 1, 1], [], []>} : vector<16x32xf32>, vector<32x32xf32>, vector<16x32xf32> -> vector<16x32xf32>
    %c0_32 = arith.constant 0 : index
    %c0_33 = arith.constant 0 : index
    %62 = vector.load %arg11[%c0_32, %c0_33] : memref<1x32xf32, #tpu.memory_space<vmem>>, vector<1x32xf32>
    %63 = vector.broadcast %62 : vector<1x32xf32> to vector<16x32xf32>
    %64 = arith.addf %61, %63 : vector<16x32xf32>
    %c0_34 = arith.constant 0 : index
    %c0_35 = arith.constant 0 : index
    %65 = vector.load %arg13[%c0_34, %c0_35] : memref<16x32xf32, #tpu.memory_space<vmem>>, vector<16x32xf32>
    tpu.vector_store %arg13[%c0_34, %c0_35], %64 {strides = array<i32>} : memref<16x32xf32, #tpu.memory_space<vmem>>, vector<16x32xf32>,
    return
  }
  func.func @transform_0(%arg0: i32) -> (i32, i32) {
    %c0_i32 = arith.constant 0 : i32
    %c0_i32_0 = arith.constant 0 : i32
    return %arg0, %c0_i32 : i32, i32
  }
  func.func @transform_1(%arg0: i32) -> (i32, i32) {
    %c0_i32 = arith.constant 0 : i32
    %c0_i32_0 = arith.constant 0 : i32
    return %arg0, %c0_i32 : i32, i32
  }
  func.func @transform_2(%arg0: i32) -> (i32, i32) {
    %c0_i32 = arith.constant 0 : i32
    %c0_i32_0 = arith.constant 0 : i32
    return %arg0, %c0_i32 : i32, i32
  }
  func.func @transform_3(%arg0: i32) -> (i32, i32) {
    %c0_i32 = arith.constant 0 : i32
    %c0_i32_0 = arith.constant 0 : i32
    %c0_i32_1 = arith.constant 0 : i32
    return %c0_i32, %c0_i32_0 : i32, i32
  }
  func.func @transform_4(%arg0: i32) -> (i32, i32) {
    %c0_i32 = arith.constant 0 : i32
    %c0_i32_0 = arith.constant 0 : i32
    %c0_i32_1 = arith.constant 0 : i32
    return %c0_i32, %c0_i32_0 : i32, i32
  }
  func.func @transform_5(%arg0: i32) -> (i32, i32) {
    %c0_i32 = arith.constant 0 : i32
    %c0_i32_0 = arith.constant 0 : i32
    %c0_i32_1 = arith.constant 0 : i32
    return %c0_i32, %c0_i32_0 : i32, i32
  }
  func.func @transform_6(%arg0: i32) -> (i32, i32) {
    %c0_i32 = arith.constant 0 : i32
    %c0_i32_0 = arith.constant 0 : i32
    %c0_i32_1 = arith.constant 0 : i32
    return %c0_i32, %c0_i32_0 : i32, i32
  }
  func.func @transform_7(%arg0: i32) -> (i32, i32) {
    %c0_i32 = arith.constant 0 : i32
    %c0_i32_0 = arith.constant 0 : i32
    %c0_i32_1 = arith.constant 0 : i32
    return %c0_i32, %c0_i32_0 : i32, i32
  }
  func.func @transform_8(%arg0: i32) -> (i32, i32) {
    %c0_i32 = arith.constant 0 : i32
    %c0_i32_0 = arith.constant 0 : i32
    %c0_i32_1 = arith.constant 0 : i32
    return %c0_i32, %c0_i32_0 : i32, i32
  }
  func.func @transform_9(%arg0: i32) -> (i32, i32) {
    %c0_i32 = arith.constant 0 : i32
    %c0_i32_0 = arith.constant 0 : i32
    %c0_i32_1 = arith.constant 0 : i32
    return %c0_i32, %c0_i32_0 : i32, i32
  }
  func.func @transform_10(%arg0: i32) -> (i32, i32) {
    %c0_i32 = arith.constant 0 : i32
    %c0_i32_0 = arith.constant 0 : i32
    %c0_i32_1 = arith.constant 0 : i32
    return %c0_i32, %c0_i32_0 : i32, i32
  }
  func.func @transform_11(%arg0: i32) -> (i32, i32) {
    %c0_i32 = arith.constant 0 : i32
    %c0_i32_0 = arith.constant 0 : i32
    return %arg0, %c0_i32 : i32, i32
  }
  func.func @transform_12(%arg0: i32) -> (i32, i32) {
    %c0_i32 = arith.constant 0 : i32
    %c0_i32_0 = arith.constant 0 : i32
    return %arg0, %c0_i32 : i32, i32
  }
}

</mosaic_0001>

<bundles_post_ra>
// kernel: tpu_custom_call.1
= control target key start
LH: loop header
LB: loop body
LE: loop exit
PB: predicated region body
PF: predicated region fallthrough
CT: control target
= control target key end

     0   :  { %18 = vsyncpa [#allocation3], 0  ;;  %s613_s0 = inlined_call_operand.hbm [shape: f32[16,32], index: 0, kind: input, shape index: {}]   ;;  %s614_s1 = inlined_call_operand.vmem [shape: f32[16,3], index: 1, kind: input, shape index: {}]   ;;  %s615_s2 = inlined_call_operand.vmem [shape: f32[16,1], index: 2, kind: input, shape index: {}]   ;;  %s616_s3 = inlined_call_operand.vmem [shape: f32[3,32], index: 3, kind: input, shape index: {}]   ;;  %s617_s4 = inlined_call_operand.vmem [shape: f32[1,32], index: 4, kind: input, shape index: {}]   ;;  %s618_s5 = inlined_call_operand.vmem [shape: f32[1,32], index: 5, kind: input, shape index: {}]   ;;  %s619_s6 = inlined_call_operand.vmem [shape: f32[1,32], index: 6, kind: input, shape index: {}]   ;;  %s620_s7 = inlined_call_operand.vmem [shape: f32[1,32], index: 7, kind: input, shape index: {}]   ;;  %s621_s8 = inlined_call_operand.vmem [shape: f32[1,32], index: 8, kind: input, shape index: {}]   ;;  %s622_s9 = inlined_call_operand.vmem [shape: f32[32,32], index: 9, kind: input, shape index: {}]   ;;  %s623_s10 = inlined_call_operand.vmem [shape: f32[1,32], index: 10, kind: input, shape index: {}]   ;;  %s624_s11 = inlined_call_operand.hbm [shape: f32[16,32], index: 11, kind: output, shape index: {0}]   ;;  %s625_s12 = inlined_call_operand.hbm [shape: f32[16,32], index: 12, kind: output, shape index: {1}]  }
   0x1   :  { %19 = vsyncpa [#allocation4], 0 }
   0x2   :  { %20 = vsyncpa [#allocation7], 0  ;;  %s25_s23 = sshll.u32 %s613_s0, 4  ;;  %s428_s24 = smov [#allocation2]   ;;  %s26_s23 = int_to_ptr.hbm [resolvable:$true] %s25_s23 }
   0x3   :  { %s27_s25 = sshll.u32 %s428_s24, 4  ;;  %s429_s26 = smov 128   ;;  %s28_s25 = int_to_ptr.vmem [resolvable:$true] %s27_s25 }
   0x4   :  { %s430_s27 = smov 8  }
   0x5   :  { %33 = dma.hbm_to_vmem [thread:$0]  %s26_s23, 256, %s28_s25, [#allocation3], %s429_s26, %s429_s26, %s430_s27  }
   0x6   :  { %422 = dma.done.wait [#allocation3], 256  }
   0x7   :  { %423 = vsyncadd [#allocation3], 4294967040  ;;  %vm138_vm0 = vcmask 1042432   ;;  %vm131_vm1 = vcmask 23552   ;;  %vm62_vm2 = vcmask 261120   ;;  %v124_v1 = vld [vmem:[%s614_s1] sm:$0xff] }
   0x8   :  { %v126_v0 = vld [vmem:[%s616_s3] sm:$0x7]  ;;  %v125_v2 = vld [vmem:[%s614_s1 + $0x8] sm:$0xff]  ;;  %v431_v7 = vmov 32.0   ;;  %v432_v36 = vmov 0   ;;  %v242_v51 = vld [vmem:[%s622_s9 + $0x18] sm:$0xff] }
   0x9   :  { %315 = vmatpush.msk.msra.mxu0 %vm138_vm0, %v126_v0  ;;  %320 = vmatpush.msk.msra.mxu3 %vm138_vm0, %v126_v0  ;;  %v59_v3 = vld [vmem:[#allocation2 + $0x8] sm:$0xff]  ;;  %v58_v4 = vld [vmem:[#allocation2] sm:$0xff]  ;;  %340 = vrcp.f32 %v431_v7  ;;  %v241_v53 = vld [vmem:[%s622_s9 + $0x10] sm:$0xff]  ;;  %s284_s1 = sshll.u32 %s624_s11, 4  ;;  %s434_s15 = smov [#allocation6]   ;;  %s285_s1 = int_to_ptr.hbm [resolvable:$true] %s284_s1 }
   0xa   :  { %316 = vmatmul.msk.f32.vlgmr.msra.gmra.mxu0 %vm131_vm1, %v124_v1  ;;  %317 = vmatmul.msk.f32.vlgmr.msra.gmra.mxu3 %vm131_vm1, %v125_v2  ;;  %v66_v5 = vsel %vm62_vm2, %v59_v3, 0.0  ;;  %v63_v6 = vsel %vm62_vm2, %v58_v4, 0.0  ;;  %v334_v18 = vld [vmem:[%s617_s4] ss:$0 sm:$0xff]  ;;  %v224_v43 = vld [vmem:[%s615_s2 + $0x8] sm:$0xff]  ;;  %s295_s16 = sshll.u32 %s434_s15, 4  ;;  %s296_s16 = int_to_ptr.vmem [resolvable:$true] %s295_s16 }
   0xb   :  { %67 = vadd.xlane.f32.xlu0 %v66_v5  ;;  %64 = vadd.xlane.f32.xlu1 %v63_v6  ;;  %v223_v34 = vld [vmem:[%s615_s2] sm:$0xff]  ;;  %v240_v54 = vld [vmem:[%s622_s9 + $0x8] sm:$0xff]  ;;  %s297_s11 = sshll.u32 %s625_s12, 4  ;;  %s298_s11 = int_to_ptr.hbm [resolvable:$true] %s297_s11 }
   0xc   :  { %333 = vset.pattern.permute.xlu0 %v432_v36  ;;  %332 = vset.pattern.permute.xlu2 %v432_v36  ;;  %v239_v58 = vld [vmem:[%s622_s9] sm:$0xff] }
   0xd   :  { %265 = vmatpush.msra.mxu1 %v242_v51  ;;  %321 = vmatpush.msra.mxu2 %v242_v51 }
   0xf   :  { %v341_v8 = vpop.eup %340  ;;  %266 = vmatpush.msra.mxu1 %v241_v53  ;;  %322 = vmatpush.msra.mxu2 %v241_v53 }
  0x10   :  { %v70_v9 = vmul.f32 32.0, %v341_v8  ;;  %vm74_vm3 = vweird.f32 %v341_v8 }
  0x11   :  { %267 = vmatpush.msra.mxu1 %v240_v54  ;;  %323 = vmatpush.msra.mxu2 %v240_v54 }
  0x12   :  { %v71_v10 = vsub.f32 1.0, %v70_v9 }
  0x13   :  { %268 = vmatpush.msra.mxu1 %v239_v58  ;;  %324 = vmatpush.msra.mxu2 %v239_v58 }
  0x14   :  { %v72_v11 = vmul.f32 %v341_v8, %v71_v10 }
  0x16   :  { %v73_v12 = vadd.f32 %v341_v8, %v72_v11 }
  0x18   :  { %v517_v13 = vsel %vm74_vm3, %v341_v8, %v73_v12 }
  0x7e   :  { %v68_v14 = vpop.xlane.xlu0 %67  ;;  %v65_v21 = vpop.xlane.xlu1 %64 }
  0x7f   :  { %v77_v15 = vmul.f32 %v517_v13, %v68_v14  ;;  %v76_v24 = vmul.f32 %v517_v13, %v65_v21  ;;  %v335_v21 = vld [vmem:[%s618_s5] ss:$0 sm:$0xff] }
  0x81   :  { %v520_v16 = vsub.f32 %v59_v3, %v77_v15  ;;  %v530_v27 = vsub.f32 %v58_v4, %v76_v24 }
  0x83   :  { %v81_v17 = vmul.f32 %v520_v16, %v520_v16  ;;  %v80_v29 = vmul.f32 %v530_v27, %v530_v27 }
  0x85   :  { %v85_v19 = vsel %vm62_vm2, %v81_v17, 0.0  ;;  %v82_v30 = vsel %vm62_vm2, %v80_v29, 0.0 }
  0x86   :  { %86 = vadd.xlane.f32.xlu2 %v85_v19 }
  0x87   :  { %v159_v20 = vpop.f32.mrf.mxu0 }
  0x88   :  { %v160_v22 = vadd.f32 %v334_v18, %v159_v20 }
  0x8a   :  { %v167_v23 = vsel %vm62_vm2, %v160_v22, 0.0 }
  0x8b   :  { %168 = vadd.xlane.f32.xlu1 %v167_v23 }
  0x8d   :  { %v162_v25 = vpop.f32.mrf.mxu3 }
  0x8e   :  { %v163_v26 = vadd.f32 %v334_v18, %v162_v25 }
  0x90   :  { %v170_v28 = vsel %vm62_vm2, %v163_v26, 0.0 }
  0x91   :  { %171 = vadd.xlane.f32.xlu0 %v170_v28 }
  0x99   :  { %83 = vadd.xlane.f32.xlu0 %v82_v30  ;;  %v336_v30 = vld [vmem:[%s619_s6] ss:$0 sm:$0xff]  ;;  %s433_s6 = smov [#allocation5]  }
  0xad   :  { %227 = vperm.xlu0 %333, %v223_v34  }
  0xf9   :  { %v87_v46 = vpop.xlane.xlu2 %86 }
  0xfa   :  { %v89_v48 = vmul.f32 %v87_v46, %v517_v13 }
  0xfc   :  { %v91_v49 = vadd.f32 1e-05, %v89_v48 }
  0xfe   :  { %v169_v31 = vpop.xlane.xlu1 %168  ;;  %vm108_vm7 = vweird.f32 %v91_v49 }
  0xff   :  { %v173_v32 = vmul.f32 %v169_v31, %v517_v13 }
 0x101   :  { %v537_v33 = vsub.f32 %v160_v22, %v173_v32  ;;  %v337_v22 = vld [vmem:[%s620_s7] ss:$0 sm:$0xff]  ;;  %s282_s7 = sshll.u32 %s433_s6, 4  ;;  %s283_s7 = int_to_ptr.vmem [resolvable:$true] %s282_s7 }
 0x103   :  { %v177_v35 = vmul.f32 %v537_v33, %v537_v33 }
 0x104   :  { %v172_v37 = vpop.xlane.xlu0 %171 }
 0x105   :  { %v174_v38 = vmul.f32 %v172_v37, %v517_v13  ;;  %v179_v39 = vsel %vm62_vm2, %v177_v35, 0.0 }
 0x106   :  { %180 = vadd.xlane.f32.xlu1 %v179_v39 }
 0x107   :  { %v546_v40 = vsub.f32 %v163_v26, %v174_v38 }
 0x109   :  { %v178_v41 = vmul.f32 %v546_v40, %v546_v40 }
 0x10b   :  { %v182_v42 = vsel %vm62_vm2, %v178_v41, 0.0 }
 0x10c   :  { %183 = vadd.xlane.f32.xlu2 %v182_v42  ;;  %v84_v44 = vpop.xlane.xlu0 %83 }
 0x10d   :  { %v88_v45 = vmul.f32 %v84_v44, %v517_v13 }
 0x10f   :  { %v90_v47 = vadd.f32 1e-05, %v88_v45 }
 0x111   :  { %342 = vrsqrt.f32 %v90_v47  ;;  %vm98_vm4 = vweird.f32 %v90_v47 }
 0x112   :  { %344 = vrsqrt.f32 %v91_v49 }
 0x117   :  { %v343_v50 = vpop.eup %342 }
 0x118   :  { %v93_v52 = vmul.f32 %v343_v50, %v90_v47  ;;  %v345_v55 = vpop.eup %344  ;;  %vm99_vm5 = vweird.f32 %v343_v50 }
 0x119   :  { %v103_v60 = vmul.f32 %v345_v55, %v91_v49  ;;  %vm100_vm6 = vmor %vm98_vm4, %vm99_vm5  ;;  %vm109_vm8 = vweird.f32 %v345_v55 }
 0x11a   :  { %v94_v56 = vmul.f32 %v343_v50, %v93_v52  ;;  %vm570_vm10 = vmor %vm108_vm7, %vm109_vm8 }
 0x11b   :  { %v104_v63 = vmul.f32 %v345_v55, %v103_v60 }
 0x11c   :  { %v95_v62 = vmul.f32 0.5, %v94_v56 }
 0x11d   :  { %v105_v4 = vmul.f32 0.5, %v104_v63 }
 0x11e   :  { %v96_v2 = vsub.f32 1.5, %v95_v62 }
 0x11f   :  { %v106_v8 = vsub.f32 1.5, %v105_v4  ;;  %v228_v38 = vpop.permute.xlu0 %227 }
 0x120   :  { %v97_v6 = vmul.f32 %v343_v50, %v96_v2 }
 0x121   :  { %v107_v14 = vmul.f32 %v345_v55, %v106_v8 }
 0x122   :  { %v101_v10 = vsel %vm100_vm6, %v343_v50, %v97_v6 }
 0x123   :  { %v112_v18 = vmul.f32 %v101_v10, %v530_v27  ;;  %v111_v23 = vsel %vm570_vm10, %v345_v55, %v107_v14  ;;  %v338_v27 = vld [vmem:[%s621_s8] ss:$0 sm:$0xff] }
 0x124   :  { %232 = vperm.xlu2 %332, %v224_v43   ;;  %v113_v32 = vmul.f32 %v111_v23, %v520_v16 }
 0x125   :  { %v117_v26 = vmul.f32 %v335_v21, %v112_v18 }
 0x126   :  { %v118_v41 = vmul.f32 %v335_v21, %v113_v32 }
 0x127   :  { %v122_v35 = vadd.f32 %v336_v30, %v117_v26 }
 0x128   :  { %v123_v44 = vadd.f32 %v336_v30, %v118_v41 }
 0x179   :  { %v181_v57 = vpop.xlane.xlu1 %180 }
 0x17a   :  { %v185_v59 = vmul.f32 %v181_v57, %v517_v13 }
 0x17c   :  { %v187_v61 = vadd.f32 1e-05, %v185_v59 }
 0x17e   :  { %346 = vrsqrt.f32 %v187_v61  ;;  %vm195_vm11 = vweird.f32 %v187_v61 }
 0x17f   :  { %v184_v0 = vpop.xlane.xlu2 %183 }
 0x180   :  { %v186_v1 = vmul.f32 %v184_v0, %v517_v13 }
 0x182   :  { %v188_v3 = vadd.f32 1e-05, %v186_v1 }
 0x184   :  { %v347_v5 = vpop.eup %346  ;;  %348 = vrsqrt.f32 %v188_v3  ;;  %vm205_vm14 = vweird.f32 %v188_v3 }
 0x185   :  { %v190_v7 = vmul.f32 %v347_v5, %v187_v61  ;;  %vm196_vm9 = vweird.f32 %v347_v5 }
 0x186   :  { %vm197_vm12 = vmor %vm195_vm11, %vm196_vm9 }
 0x187   :  { %v191_v9 = vmul.f32 %v347_v5, %v190_v7  ;;  %v233_v16 = vpop.permute.xlu2 %232 }
 0x189   :  { %v192_v11 = vmul.f32 0.5, %v191_v9 }
 0x18a   :  { %v349_v12 = vpop.eup %348 }
 0x18b   :  { %v193_v15 = vsub.f32 1.5, %v192_v11  ;;  %v200_v13 = vmul.f32 %v349_v12, %v188_v3  ;;  %vm206_vm13 = vweird.f32 %v349_v12 }
 0x18c   :  { %vm207_vm15 = vmor %vm205_vm14, %vm206_vm13 }
 0x18d   :  { %v194_v19 = vmul.f32 %v347_v5, %v193_v15  ;;  %v201_v20 = vmul.f32 %v349_v12, %v200_v13 }
 0x18f   :  { %v198_v24 = vsel %vm197_vm12, %v347_v5, %v194_v19  ;;  %v202_v25 = vmul.f32 0.5, %v201_v20 }
 0x190   :  { %v209_v28 = vmul.f32 %v198_v24, %v537_v33 }
 0x191   :  { %v203_v29 = vsub.f32 1.5, %v202_v25 }
 0x192   :  { %v214_v31 = vmul.f32 %v337_v22, %v209_v28 }
 0x193   :  { %v204_v34 = vmul.f32 %v349_v12, %v203_v29 }
 0x194   :  { %v219_v36 = vadd.f32 %v338_v27, %v214_v31 }
 0x195   :  { %v208_v37 = vsel %vm207_vm15, %v349_v12, %v204_v34 }
 0x196   :  { %v221_v39 = vadd.f32 %v219_v36, %v122_v35  ;;  %v210_v33 = vmul.f32 %v208_v37, %v546_v40  ;;  %v339_v40 = vld [vmem:[%s623_s10] ss:$0 sm:$0xff] }
 0x198   :  { %v235_v42 = vmul.f32 %v228_v38, %v221_v39  ;;  %v215_v43 = vmul.f32 %v337_v22, %v210_v33 }
 0x19a   :  { %237 = vst.msk [vmem:[#allocation5] sm:$0xff] %vm62_vm2, %v235_v42  ;;  %318 = vmatmul.msk.f32.vlgmr.msra.gmra.mxu1 %vm62_vm2, %v235_v42  ;;  %v220_v45 = vadd.f32 %v338_v27, %v215_v43 }
 0x19c   :  { %v222_v46 = vadd.f32 %v220_v45, %v123_v44 }
 0x19e   :  { %v236_v47 = vmul.f32 %v233_v16, %v222_v46 }
 0x1a0   :  { %238 = vst.msk [vmem:[#allocation5 + $0x8] sm:$0xff] %vm62_vm2, %v236_v47  ;;  %319 = vmatmul.msk.f32.vlgmr.msra.gmra.mxu2 %vm62_vm2, %v236_v47 }
 0x1a1   :  { %290 = dma.vmem_to_hbm [thread:$0]  %s283_s7, 256, %s285_s1, [#allocation4], %s429_s26, %s429_s26, %s430_s27  }
 0x217   :  { %v270_v48 = vpop.f32.mrf.mxu1 }
 0x218   :  { %v271_v49 = vadd.f32 %v339_v40, %v270_v48 }
 0x21a   :  { %276 = vst.msk [vmem:[#allocation6] sm:$0xff] %vm62_vm2, %v271_v49 }
 0x223   :  { %v273_v50 = vpop.f32.mrf.mxu2 }
 0x224   :  { %v274_v51 = vadd.f32 %v339_v40, %v273_v50 }
 0x226   :  { %277 = vst.msk [vmem:[#allocation6 + $0x8] sm:$0xff] %vm62_vm2, %v274_v51 }
 0x227   :  { %303 = dma.vmem_to_hbm [thread:$0]  %s296_s16, 256, %s298_s11, [#allocation7], %s429_s26, %s429_s26, %s430_s27  }
 0x228   :  { %424 = dma.done.wait [#allocation4], 256  }
 0x229   :  { %425 = vsyncadd [#allocation4], 4294967040 }
 0x22a   :  { %426 = dma.done.wait [#allocation7], 256  }
 0x22b   :  { %427 = vsyncadd [#allocation7], 4294967040 }
 0x22c   :  { %312 = vsyncpa [#allocation3], 1 }
 0x22d   :  { %313 = vsyncpa [#allocation4], 1 }
 0x22e   :  { %314 = vsyncpa [#allocation7], 1 }

</bundles_post_ra>
